<compile_context>
chip_gen: v5e
topology: v5e:2x2
jax: 0.10.0
libtpu: 0.0.40
codegen_flags: <defaults>
</compile_context>

<pallas_src>
import functools
import math

import jax
import jax.numpy as jnp
from jax.experimental import pallas as pl
from jax.experimental.pallas import tpu as pltpu


# ---------------------------------------------------------------------------
# Kernels
# ---------------------------------------------------------------------------

def _mlp_kernel_single(x_ref, w1_ref, b1_ref, w2_ref, b2_ref, o_ref):
    """Single-k kernel: whole mlp dim resident in VMEM; no accumulator scratch.

    x_ref: (tm, H) block, w1_ref: (H, M), b1_ref: (1, M), w2_ref: (M, H),
    b2_ref: (1, H) -- all weights un-blocked / resident.  o_ref: (tm, H) block.
    """
    # fc1: (tm, H) @ (H, M) -> (tm, M); MXU with f32 accumulation.
    h = jnp.dot(x_ref[...], w1_ref[...], preferred_element_type=jnp.float32)
    h = h + b1_ref[...].astype(jnp.float32)

    # Exact GELU (erf-based), matching torch.nn.functional.gelu default.
    h = 0.5 * h * (1.0 + jax.lax.erf(h * (1.0 / math.sqrt(2.0))))

    # dropout -> identity (eval mode)

    # fc2: (tm, M) @ (M, H) -> (tm, H); cast h to the weight dtype for the bf16 path.
    out = jnp.dot(h.astype(w2_ref.dtype), w2_ref[...],
                  preferred_element_type=jnp.float32)
    out = out + b2_ref[...].astype(jnp.float32)

    # dropout -> identity (eval mode)
    o_ref[...] = out.astype(o_ref.dtype)


def _mlp_kernel_multi(x_ref, w1_ref, b1_ref, w2_ref, b2_ref, o_ref, acc_ref):
    """Multi-k kernel: mlp dim tiled (reduction axis last), f32 accumulator scratch.

    x_ref: (tm, H), w1_ref: (H, mk), b1_ref: (1, mk), w2_ref: (mk, H),
    b2_ref: (1, H) resident, o_ref: (tm, H), acc_ref: (tm, H) f32 scratch.
    """
    k = pl.program_id(1)

    @pl.when(k == 0)
    def _():
        # Fold the fc2 bias into the accumulator init.
        acc_ref[...] = jnp.broadcast_to(b2_ref[...], acc_ref.shape).astype(jnp.float32)

    h = jnp.dot(x_ref[...], w1_ref[...], preferred_element_type=jnp.float32)
    h = h + b1_ref[...].astype(jnp.float32)
    h = 0.5 * h * (1.0 + jax.lax.erf(h * (1.0 / math.sqrt(2.0))))

    # dropout -> identity (eval mode)

    acc_ref[...] += jnp.dot(h.astype(w2_ref.dtype), w2_ref[...],
                            preferred_element_type=jnp.float32)

    # dropout -> identity (eval mode)
    @pl.when(k == pl.num_programs(1) - 1)
    def _():
        o_ref[...] = acc_ref[...].astype(o_ref.dtype)


# ---------------------------------------------------------------------------
# Tile planning
# ---------------------------------------------------------------------------

def _vmem_capacity_bytes():
    try:
        return int(pltpu.get_tpu_info().vmem_capacity_bytes)
    except Exception:
        return 128 * 2**20  # v5e/v6e class default


def _plan_tiles(T, H, M, x_isz, w_isz, o_isz, block_tokens, block_mlp,
                vmem_cap, prefer_mk_tiling):
    """Pick (token_tile tm, mlp_tile mk) under the VMEM budget.  Returns (tm, mk, est)."""
    sub = 16 if min(x_isz, w_isz) < 4 else 8  # sublane packing (bf16 vs f32)

    tm = min(block_tokens, pl.cdiv(T, sub) * sub)
    tm = max(sub, (tm // sub) * sub)
    mk = M if block_mlp is None else block_mlp
    assert M % mk == 0, "block_mlp must divide mlp_dim"
    assert mk == M or mk % 128 == 0, "block_mlp must be a multiple of 128"

    def est(tm_, mk_):
        if mk_ == M:
            # Single-k plan: weights fully resident in VMEM (single copy, fetched once).
            weights = (H * M + M + M * H + H) * w_isz
            dbuf = 2 * tm_ * H * (x_isz + o_isz)       # pipelined x / out tiles
            live = tm_ * M * 4 + tm_ * H * 4           # f32 h + f32 fc2 result
            if w_isz < 4:
                live += tm_ * M * w_isz                # bf16 cast copy of h
            return weights + dbuf + live
        # Multi-k plan: w1/b1/w2 chunks are pipelined (double-buffered), b2 resident.
        dbuf = 2 * (tm_ * H * x_isz + tm_ * H * o_isz
                    + H * mk_ * w_isz + mk_ * w_isz + mk_ * H * w_isz)
        resident = H * w_isz                           # b2
        acc = tm_ * H * 4                              # accumulator scratch
        live = tm_ * mk_ * 4                           # f32 h chunk
        if w_isz < 4:
            live += tm_ * mk_ * w_isz                  # bf16 cast copy of h chunk
        return dbuf + resident + acc + live

    def halve_tm(tm_, floor):
        return max(floor, max(sub, (tm_ // 2 // sub) * sub))

    floor_hi = max(sub, min(tm, 256))   # keep >=256 MXU rows occupied when possible
    floor_lo = sub

    if prefer_mk_tiling:
        # v7x-style (64 MiB VMEM, 3.2 TB/s HBM): restreaming weight chunks is cheap;
        # keep the token tile large, tile the mlp dim first.
        while est(tm, mk) > vmem_cap and mk % 256 == 0:
            mk //= 2
        while est(tm, mk) > vmem_cap and tm > floor_hi:
            tm = halve_tm(tm, floor_hi)
        while est(tm, mk) > vmem_cap and tm > floor_lo:
            tm = halve_tm(tm, floor_lo)
    else:
        # v5e/v6e (128 MiB VMEM, lower HBM BW): keep the weights fully resident
        # (fetched from HBM exactly once); shrink the token tile first.
        while est(tm, mk) > vmem_cap and tm > floor_hi:
            tm = halve_tm(tm, floor_hi)
        while est(tm, mk) > vmem_cap and mk % 256 == 0:
            mk //= 2
        while est(tm, mk) > vmem_cap and tm > floor_lo:
            tm = halve_tm(tm, floor_lo)

    return tm, mk, est(tm, mk)


# ---------------------------------------------------------------------------
# Wrapper
# ---------------------------------------------------------------------------

@functools.partial(jax.jit, static_argnames=("block_tokens", "block_mlp",
                                              "compute_dtype", "vmem_cap_bytes"))
def mlp_pallas(x, w1, b1, w2, b2, *, block_tokens=512, block_mlp=None,
               compute_dtype=None, vmem_cap_bytes=None):
    """x: (..., H); w1: (H, M); b1: (M,); w2: (M, H); b2: (H,).

    compute_dtype=jnp.bfloat16 enables the bf16 MXU path (f32 accumulation kept);
    the output dtype always matches the input dtype.
    """
    orig_shape = x.shape
    out_dtype = x.dtype
    H = orig_shape[-1]
    M = w1.shape[1]
    x2d = x.reshape(-1, H)
    T = x2d.shape[0]

    if compute_dtype is not None:
        x2d = x2d.astype(compute_dtype)
        w1 = w1.astype(compute_dtype)
        w2 = w2.astype(compute_dtype)
        b1 = b1.astype(compute_dtype)
        b2 = b2.astype(compute_dtype)

    x_isz = jnp.dtype(x2d.dtype).itemsize
    w_isz = jnp.dtype(w1.dtype).itemsize
    o_isz = jnp.dtype(out_dtype).itemsize

    # Generation-aware VMEM budget (per TensorCore).
    capacity = _vmem_capacity_bytes()
    if capacity <= 80 * 2**20:
        # v7x-class: 64 MiB physical; leave Mosaic scratch headroom, prefer mk tiling.
        vmem_cap = max(16 * 2**20, capacity - 18 * 2**20)
        prefer_mk_tiling = True
    else:
        # v5e/v6e-class: 128 MiB physical; keep weights resident, shrink tokens first.
        vmem_cap = min(100 * 2**20, capacity - 28 * 2**20)
        prefer_mk_tiling = False
    if vmem_cap_bytes is not None:
        vmem_cap = vmem_cap_bytes

    tm, mk, est = _plan_tiles(T, H, M, x_isz, w_isz, o_isz,
                              block_tokens, block_mlp, vmem_cap, prefer_mk_tiling)

    b1_2d = b1.reshape(1, M)
    b2_2d = b2.reshape(1, H)

    # Ragged token axis handled by Pallas (OOB reads padded, OOB writes dropped);
    # no wrapper-side jnp.pad / extra HBM copy of the activations.
    nt = pl.cdiv(T, tm)

    # Compiler VMEM limit tied to the same budget as the tile plan.
    vmem_limit = int(min(max(int(est * 1.25) + (4 << 20), 32 * 2**20),
                         max(capacity - 8 * 2**20, est + (2 << 20))))
    vmem_limit = max(vmem_limit, est + (2 << 20))

    if mk == M:
        # Common case: weights fully resident (single copy, fetched once), no reduction
        # axis, no accumulator scratch, 1-D token grid (sharded across TCs on v7x).
        out = pl.pallas_call(
            _mlp_kernel_single,
            out_shape=jax.ShapeDtypeStruct((T, H), out_dtype),
            grid=(nt,),
            in_specs=[
                pl.BlockSpec((tm, H), lambda i: (i, 0)),                 # x tile
                pl.BlockSpec(memory_space=pltpu.MemorySpace.VMEM),       # w1 resident
                pl.BlockSpec(memory_space=pltpu.MemorySpace.VMEM),       # b1 resident
                pl.BlockSpec(memory_space=pltpu.MemorySpace.VMEM),       # w2 resident
                pl.BlockSpec(memory_space=pltpu.MemorySpace.VMEM),       # b2 resident
            ],
            out_specs=pl.BlockSpec((tm, H), lambda i: (i, 0)),
            compiler_params=pltpu.CompilerParams(
                dimension_semantics=("parallel",),
                vmem_limit_bytes=vmem_limit,
            ),
        )(x2d, w1, b1_2d, w2, b2_2d)
    else:
        # VMEM-constrained case: tile the mlp dim (reduction axis last) with an f32
        # accumulator scratch; fc2 bias folded into the accumulator init.
        out = pl.pallas_call(
            _mlp_kernel_multi,
            out_shape=jax.ShapeDtypeStruct((T, H), out_dtype),
            grid=(nt, M // mk),
            in_specs=[
                pl.BlockSpec((tm, H), lambda i, k: (i, 0)),              # x tile
                pl.BlockSpec((H, mk), lambda i, k: (0, k)),              # w1 chunk
                pl.BlockSpec((1, mk), lambda i, k: (0, k)),              # b1 chunk
                pl.BlockSpec((mk, H), lambda i, k: (k, 0)),              # w2 chunk
                pl.BlockSpec(memory_space=pltpu.MemorySpace.VMEM),       # b2 resident
            ],
            out_specs=pl.BlockSpec((tm, H), lambda i, k: (i, 0)),
            scratch_shapes=[pltpu.VMEM((tm, H), jnp.float32)],
            compiler_params=pltpu.CompilerParams(
                dimension_semantics=("parallel", "arbitrary"),
                vmem_limit_bytes=vmem_limit,
            ),
        )(x2d, w1, b1_2d, w2, b2_2d)

    return out.reshape(orig_shape)


# ---------------------------------------------------------------------------
# Init / reference / demo
# ---------------------------------------------------------------------------

def _xavier_uniform(key, fan_in, fan_out, dtype=jnp.float32):
    # matches torch.nn.init.xavier_uniform_ (gain=1)
    limit = math.sqrt(6.0 / (fan_in + fan_out))
    return jax.random.uniform(key, (fan_in, fan_out), dtype=dtype,
                              minval=-limit, maxval=limit)


def init_mlp_params(key, hidden_size, mlp_dim, dtype=jnp.float32):
    k1, k2, k3, k4 = jax.random.split(key, 4)
    # stored as (in_features, out_features) == torch weight.T
    w1 = _xavier_uniform(k1, hidden_size, mlp_dim, dtype)
    w2 = _xavier_uniform(k2, mlp_dim, hidden_size, dtype)
    b1 = 1e-6 * jax.random.normal(k3, (mlp_dim,), dtype=dtype)
    b2 = 1e-6 * jax.random.normal(k4, (hidden_size,), dtype=dtype)
    return w1, b1, w2, b2


def mlp_reference(x, w1, b1, w2, b2):
    h = jnp.dot(x, w1) + b1
    h = 0.5 * h * (1.0 + jax.lax.erf(h / jnp.sqrt(2.0)))
    return jnp.dot(h, w2) + b2


if __name__ == "__main__":
    # config.hidden_size = 32, config.transformer['mlp_dim'] = 64
    batch, seq, hidden, mlp_dim = 2, 8, 32, 64

    key = jax.random.PRNGKey(0)
    kx, kp = jax.random.split(key)
    x = jax.random.normal(kx, (batch, seq, hidden), dtype=jnp.float32)
    w1, b1, w2, b2 = init_mlp_params(kp, hidden, mlp_dim)

    out = mlp_pallas(x, w1, b1, w2, b2)
    out = jax.block_until_ready(out)

    ref = mlp_reference(x, w1, b1, w2, b2)
    assert out.shape == x.shape
    assert jnp.allclose(out, ref, atol=1e-4, rtol=1e-4), "mismatch vs reference"

    print("KERNEL_OK")
</pallas_src>

<mosaic_0001>
module attributes {stable_mosaic.version = 11 : i64} {
  func.func @_mlp_kernel_single(%arg0: i32, %arg1: memref<16x32xf32, #tpu.memory_space<vmem>>, %arg2: memref<32x64xf32, #tpu.memory_space<vmem>>, %arg3: memref<1x64xf32, #tpu.memory_space<vmem>>, %arg4: memref<64x32xf32, #tpu.memory_space<vmem>>, %arg5: memref<1x32xf32, #tpu.memory_space<vmem>>, %arg6: memref<16x32xf32, #tpu.memory_space<vmem>>) attributes {dimension_semantics = [#tpu.dimension_semantics<parallel>], iteration_bounds = array<i64: 1>, scalar_prefetch = 0 : i64, scratch_operands = 0 : i64, tpu.core_type = #tpu.core_type<tc>, window_params = [{transform_indices = @transform_0, window_bounds = array<i64: 16, 32>}, {pipeline_mode = #tpu.pipeline_mode<synchronous>, transform_indices = @transform_1, window_bounds = array<i64: 32, 64>}, {pipeline_mode = #tpu.pipeline_mode<synchronous>, transform_indices = @transform_2, window_bounds = array<i64: 1, 64>}, {pipeline_mode = #tpu.pipeline_mode<synchronous>, transform_indices = @transform_3, window_bounds = array<i64: 64, 32>}, {pipeline_mode = #tpu.pipeline_mode<synchronous>, transform_indices = @transform_4, window_bounds = array<i64: 1, 32>}, {transform_indices = @transform_5, window_bounds = array<i64: 16, 32>}]} {
    %c0 = arith.constant 0 : index
    %c0_0 = arith.constant 0 : index
    %0 = vector.load %arg1[%c0, %c0_0] : memref<16x32xf32, #tpu.memory_space<vmem>>, vector<16x32xf32>
    %c0_1 = arith.constant 0 : index
    %c0_2 = arith.constant 0 : index
    %1 = vector.load %arg2[%c0_1, %c0_2] : memref<32x64xf32, #tpu.memory_space<vmem>>, vector<32x64xf32>
    %cst = arith.constant dense<0.000000e+00> : vector<16x64xf32>
    %2 = tpu.matmul %0, %1, %cst {dimension_numbers = #tpu.dot_dimension_numbers<[1], [0], [0], [1], [0, 0, 1, 1], [], []>} : vector<16x32xf32>, vector<32x64xf32>, vector<16x64xf32> -> vector<16x64xf32>
    %c0_3 = arith.constant 0 : index
    %c0_4 = arith.constant 0 : index
    %3 = vector.load %arg3[%c0_3, %c0_4] : memref<1x64xf32, #tpu.memory_space<vmem>>, vector<1x64xf32>
    %4 = vector.broadcast %3 : vector<1x64xf32> to vector<16x64xf32>
    %5 = arith.addf %2, %4 : vector<16x64xf32>
    %cst_5 = arith.constant 5.000000e-01 : f32
    %6 = vector.broadcast %cst_5 : f32 to vector<16x64xf32>
    %7 = arith.mulf %6, %5 : vector<16x64xf32>
    %cst_6 = arith.constant 0.707106769 : f32
    %8 = vector.broadcast %cst_6 : f32 to vector<16x64xf32>
    %9 = arith.mulf %5, %8 : vector<16x64xf32>
    %10 = math.erf %9 : vector<16x64xf32>
    %cst_7 = arith.constant 1.000000e+00 : f32
    %11 = vector.broadcast %cst_7 : f32 to vector<16x64xf32>
    %12 = arith.addf %11, %10 : vector<16x64xf32>
    %13 = arith.mulf %7, %12 : vector<16x64xf32>
    %c0_8 = arith.constant 0 : index
    %c0_9 = arith.constant 0 : index
    %14 = vector.load %arg4[%c0_8, %c0_9] : memref<64x32xf32, #tpu.memory_space<vmem>>, vector<64x32xf32>
    %cst_10 = arith.constant dense<0.000000e+00> : vector<16x32xf32>
    %15 = tpu.matmul %13, %14, %cst_10 {dimension_numbers = #tpu.dot_dimension_numbers<[1], [0], [0], [1], [0, 0, 1, 1], [], []>} : vector<16x64xf32>, vector<64x32xf32>, vector<16x32xf32> -> vector<16x32xf32>
    %c0_11 = arith.constant 0 : index
    %c0_12 = arith.constant 0 : index
    %16 = vector.load %arg5[%c0_11, %c0_12] : memref<1x32xf32, #tpu.memory_space<vmem>>, vector<1x32xf32>
    %17 = vector.broadcast %16 : vector<1x32xf32> to vector<16x32xf32>
    %18 = arith.addf %15, %17 : vector<16x32xf32>
    %c0_13 = arith.constant 0 : index
    %c0_14 = arith.constant 0 : index
    %19 = vector.load %arg6[%c0_13, %c0_14] : memref<16x32xf32, #tpu.memory_space<vmem>>, vector<16x32xf32>
    tpu.vector_store %arg6[%c0_13, %c0_14], %18 {strides = array<i32>} : memref<16x32xf32, #tpu.memory_space<vmem>>, vector<16x32xf32>,
    return
  }
  func.func @transform_0(%arg0: i32) -> (i32, i32) {
    %c0_i32 = arith.constant 0 : i32
    %c0_i32_0 = arith.constant 0 : i32
    return %arg0, %c0_i32 : i32, i32
  }
  func.func @transform_1(%arg0: i32) -> (i32, i32) {
    %c0_i32 = arith.constant 0 : i32
    %c0_i32_0 = arith.constant 0 : i32
    %c0_i32_1 = arith.constant 0 : i32
    return %c0_i32, %c0_i32_0 : i32, i32
  }
  func.func @transform_2(%arg0: i32) -> (i32, i32) {
    %c0_i32 = arith.constant 0 : i32
    %c0_i32_0 = arith.constant 0 : i32
    %c0_i32_1 = arith.constant 0 : i32
    return %c0_i32, %c0_i32_0 : i32, i32
  }
  func.func @transform_3(%arg0: i32) -> (i32, i32) {
    %c0_i32 = arith.constant 0 : i32
    %c0_i32_0 = arith.constant 0 : i32
    %c0_i32_1 = arith.constant 0 : i32
    return %c0_i32, %c0_i32_0 : i32, i32
  }
  func.func @transform_4(%arg0: i32) -> (i32, i32) {
    %c0_i32 = arith.constant 0 : i32
    %c0_i32_0 = arith.constant 0 : i32
    %c0_i32_1 = arith.constant 0 : i32
    return %c0_i32, %c0_i32_0 : i32, i32
  }
  func.func @transform_5(%arg0: i32) -> (i32, i32) {
    %c0_i32 = arith.constant 0 : i32
    %c0_i32_0 = arith.constant 0 : i32
    return %arg0, %c0_i32 : i32, i32
  }
}

</mosaic_0001>

<bundles_post_ra>
// kernel: mlp_pallas.1
= control target key start
LH: loop header
LB: loop body
LE: loop exit
PB: predicated region body
PF: predicated region fallthrough
CT: control target
= control target key end

     0   :  { %s382_s0 = inlined_call_operand.vmem [shape: f32[16,32], index: 0, kind: input, shape index: {}]   ;;  %s383_s1 = inlined_call_operand.vmem [shape: f32[32,64], index: 1, kind: input, shape index: {}]   ;;  %s384_s2 = inlined_call_operand.vmem [shape: f32[1,64], index: 2, kind: input, shape index: {}]   ;;  %s385_s3 = inlined_call_operand.vmem [shape: f32[64,32], index: 3, kind: input, shape index: {}]   ;;  %s386_s4 = inlined_call_operand.vmem [shape: f32[1,32], index: 4, kind: input, shape index: {}]   ;;  %s387_s5 = inlined_call_operand.hbm [shape: f32[16,32], index: 5, kind: output, shape index: {}]  }
   0x1   :  { %v26_v0 = vld [vmem:[%s383_s1 + $0x18] sm:$0xff]  ;;  %v25_v1 = vld [vmem:[%s383_s1 + $0x10] sm:$0xff]  ;;  %v24_v2 = vld [vmem:[%s383_s1 + $0x8] sm:$0xff] }
   0x2   :  { %50 = vmatpush.msra.mxu0 %v26_v0  ;;  %217 = vmatpush.msra.mxu3 %v26_v0 }
   0x4   :  { %51 = vmatpush.msra.mxu0 %v25_v1  ;;  %218 = vmatpush.msra.mxu3 %v25_v1 }
   0x5   :  { %10 = vsyncpa [#allocation3], 0  ;;  %v23_v3 = vld [vmem:[%s383_s1] sm:$0xff]  ;;  %vm31_vm0 = vcmask 261120   ;;  %v22_v5 = vld [vmem:[%s382_s0 + $0x8] sm:$0xff]  ;;  %vm161_vm9 = vcmask 523264  }
   0x6   :  { %52 = vmatpush.msra.mxu0 %v24_v2  ;;  %219 = vmatpush.msra.mxu3 %v24_v2  ;;  %v21_v4 = vld [vmem:[%s382_s0] sm:$0xff]  ;;  %v156_v14 = vld [vmem:[%s385_s3 + $0x38] sm:$0xff]  ;;  %v155_v18 = vld [vmem:[%s385_s3 + $0x30] sm:$0xff]  ;;  %s264_s21 = smov [#allocation2]   ;;  %s199_s25 = sshll.u32 %s387_s5, 4  ;;  %s200_s25 = int_to_ptr.hbm [resolvable:$true] %s199_s25 }
   0x7   :  { %v232_v6 = vld [vmem:[%s384_s2] ss:$0 sm:$0xff]  ;;  %176 = vmatpush.msra.mxu1 %v156_v14  ;;  %221 = vmatpush.msra.mxu2 %v156_v14  ;;  %v154_v22 = vld [vmem:[%s385_s3 + $0x28] sm:$0xff]  ;;  %v152_v31 = vld [vmem:[%s385_s3 + $0x18] sm:$0xff]  ;;  %s197_s22 = sshll.u32 %s264_s21, 4  ;;  %s265_s26 = smov 128   ;;  %s198_s22 = int_to_ptr.vmem [resolvable:$true] %s197_s22 }
   0x8   :  { %53 = vmatpush.msra.mxu0 %v23_v3  ;;  %220 = vmatpush.msra.mxu3 %v23_v3  ;;  %v153_v26 = vld [vmem:[%s385_s3 + $0x20] sm:$0xff]  ;;  %v151_v35 = vld [vmem:[%s385_s3 + $0x10] sm:$0xff]  ;;  %v150_v40 = vld [vmem:[%s385_s3 + $0x8] sm:$0xff]  ;;  %s266_s27 = smov 8  }
   0x9   :  { %211 = vmatmul.msk.f32.vlgmr.msra.gmra.mxu0 %vm31_vm0, %v21_v4  ;;  %212 = vmatmul.msk.f32.vlgmr.msra.gmra.mxu3 %vm31_vm0, %v22_v5  ;;  %v149_v42 = vld [vmem:[%s385_s3] sm:$0xff] }
   0xa   :  { %177 = vmatpush.msra.mxu1 %v155_v18  ;;  %222 = vmatpush.msra.mxu2 %v155_v18 }
   0xc   :  { %178 = vmatpush.msra.mxu1 %v154_v22  ;;  %223 = vmatpush.msra.mxu2 %v154_v22 }
   0xe   :  { %179 = vmatpush.msra.mxu1 %v153_v26  ;;  %224 = vmatpush.msra.mxu2 %v153_v26 }
  0x10   :  { %180 = vmatpush.msra.mxu1 %v152_v31  ;;  %225 = vmatpush.msra.mxu2 %v152_v31 }
  0x12   :  { %181 = vmatpush.msra.mxu1 %v151_v35  ;;  %226 = vmatpush.msra.mxu2 %v151_v35 }
  0x14   :  { %182 = vmatpush.msra.mxu1 %v150_v40  ;;  %227 = vmatpush.msra.mxu2 %v150_v40 }
  0x16   :  { %183 = vmatpush.msra.mxu1 %v149_v42  ;;  %228 = vmatpush.msra.mxu2 %v149_v42 }
  0x86   :  { %v55_v7 = vpop.f32.mrf.mxu0 }
  0x87   :  { %v320_v8 = vadd.f32 %v232_v6, %v55_v7 }
  0x89   :  { %v323_v9 = vmul.f32 0.70710677, %v320_v8  ;;  %v61_v26 = vmul.f32 0.5, %v320_v8  ;;  %v233_v8 = vld [vmem:[%s386_s4] ss:$0 sm:$0xff] }
  0x8b   :  { %v65_v10 = vmul.f32 %v323_v9, %v323_v9 }
  0x8c   :  { %v58_v11 = vpop.f32.mrf.mxu3 }
  0x8d   :  { %v327_v12 = vmin.f32 %v65_v10, 16.0  ;;  %v329_v13 = vadd.f32 %v232_v6, %v58_v11 }
  0x8f   :  { %v67_v15 = vmul.f32 2.1237322e-06, %v327_v12  ;;  %v78_v16 = vmul.f32 3.8918573e-05, %v327_v12  ;;  %v337_v17 = vmul.f32 0.70710677, %v329_v13 }
  0x91   :  { %v68_v19 = vadd.f32 0.00028619796, %v67_v15  ;;  %v79_v20 = vadd.f32 0.001143296, %v78_v16  ;;  %v105_v21 = vmul.f32 %v337_v17, %v337_v17 }
  0x93   :  { %v69_v23 = vmul.f32 %v68_v19, %v327_v12  ;;  %v80_v24 = vmul.f32 %v79_v20, %v327_v12  ;;  %v106_v25 = vmin.f32 %v105_v21, 16.0 }
  0x95   :  { %v70_v27 = vadd.f32 0.0036580483, %v69_v23  ;;  %v81_v28 = vadd.f32 0.014752088, %v80_v24  ;;  %v107_v29 = vmul.f32 2.1237322e-06, %v106_v25 }
  0x96   :  { %v118_v30 = vmul.f32 3.8918573e-05, %v106_v25 }
  0x97   :  { %v82_v32 = vmul.f32 %v81_v28, %v327_v12  ;;  %v108_v33 = vadd.f32 0.00028619796, %v107_v29  ;;  %v71_v37 = vmul.f32 %v70_v27, %v327_v12 }
  0x98   :  { %v119_v34 = vadd.f32 0.001143296, %v118_v30 }
  0x99   :  { %v83_v36 = vadd.f32 0.112945676, %v82_v32  ;;  %v109_v38 = vmul.f32 %v108_v33, %v106_v25  ;;  %v72_v46 = vadd.f32 0.05243302, %v71_v37  ;;  %v62_v33 = vmul.f32 0.5, %v329_v13 }
  0x9a   :  { %v120_v39 = vmul.f32 %v119_v34, %v106_v25 }
  0x9b   :  { %v84_v41 = vmul.f32 %v83_v36, %v327_v12  ;;  %v110_v45 = vadd.f32 0.0036580483, %v109_v38  ;;  %v73_v52 = vmul.f32 %v72_v46, %v327_v12 }
  0x9c   :  { %v121_v43 = vadd.f32 0.014752088, %v120_v39 }
  0x9d   :  { %v85_v44 = vadd.f32 0.4994258, %v84_v41  ;;  %v111_v51 = vmul.f32 %v110_v45, %v106_v25  ;;  %v74_v56 = vadd.f32 0.18741608, %v73_v52 }
  0x9e   :  { %v122_v47 = vmul.f32 %v121_v43, %v106_v25 }
  0x9f   :  { %v86_v48 = vmul.f32 %v85_v44, %v327_v12  ;;  %v112_v55 = vadd.f32 0.05243302, %v111_v51  ;;  %v75_v61 = vmul.f32 %v74_v56, %v327_v12 }
  0xa0   :  { %v123_v49 = vadd.f32 0.112945676, %v122_v47 }
  0xa1   :  { %v87_v50 = vadd.f32 1.0, %v86_v48  ;;  %v113_v60 = vmul.f32 %v112_v55, %v106_v25  ;;  %v76_v2 = vadd.f32 1.1283791, %v75_v61 }
  0xa2   :  { %v124_v53 = vmul.f32 %v123_v49, %v106_v25 }
  0xa3   :  { %234 = vrcp.f32 %v87_v50  ;;  %v99_v0 = vand.u32 2147483648, %v87_v50  ;;  %v114_v1 = vadd.f32 0.18741608, %v113_v60  ;;  %v97_v4 = vand.u32 2147483647, %v87_v50 }
  0xa4   :  { %v125_v54 = vadd.f32 0.4994258, %v124_v53  ;;  %vm93_vm2 = vweird.f32 %v87_v50  ;;  %v77_v14 = vmul.f32 %v76_v2, %v323_v9 }
  0xa5   :  { %v100_v7 = vor.u32 1.1754944e-38, %v99_v0  ;;  %v115_v10 = vmul.f32 %v114_v1, %v106_v25  ;;  %vm98_vm4 = vcmp.eq.f32.partialorder %v97_v4, 8.507059e+37 }
  0xa6   :  { %v126_v57 = vmul.f32 %v125_v54, %v106_v25 }
  0xa7   :  { %v116_v20 = vadd.f32 1.1283791, %v115_v10 }
  0xa8   :  { %v127_v58 = vadd.f32 1.0, %v126_v57 }
  0xa9   :  { %v235_v59 = vpop.eup %234  ;;  %v117_v9 = vmul.f32 %v116_v20, %v337_v17 }
  0xaa   :  { %v89_v62 = vmul.f32 %v235_v59, %v87_v50  ;;  %236 = vrcp.f32 %v127_v58  ;;  %vm94_vm1 = vweird.f32 %v235_v59  ;;  %v139_v19 = vand.u32 2147483648, %v127_v58 }
  0xab   :  { %vm95_vm3 = vmor %vm93_vm2, %vm94_vm1  ;;  %v137_v22 = vand.u32 2147483647, %v127_v58  ;;  %vm133_vm6 = vweird.f32 %v127_v58 }
  0xac   :  { %v90_v63 = vsub.f32 1.0, %v89_v62  ;;  %v140_v25 = vor.u32 1.1754944e-38, %v139_v19 }
  0xad   :  { %vm138_vm8 = vcmp.eq.f32.partialorder %v137_v22, 8.507059e+37 }
  0xae   :  { %v91_v3 = vmul.f32 %v235_v59, %v90_v63 }
  0xb0   :  { %v237_v5 = vpop.eup %236  ;;  %v92_v6 = vadd.f32 %v235_v59, %v91_v3 }
  0xb1   :  { %v129_v11 = vmul.f32 %v237_v5, %v127_v58  ;;  %vm134_vm5 = vweird.f32 %v237_v5 }
  0xb2   :  { %v96_v15 = vsel %vm95_vm3, %v235_v59, %v92_v6  ;;  %vm135_vm7 = vmor %vm133_vm6, %vm134_vm5 }
  0xb3   :  { %v101_v12 = vsel %vm98_vm4, %v100_v7, %v96_v15  ;;  %v130_v16 = vsub.f32 1.0, %v129_v11 }
  0xb4   :  { %v102_v18 = vmul.f32 %v101_v12, %v77_v14 }
  0xb5   :  { %v131_v21 = vmul.f32 %v237_v5, %v130_v16 }
  0xb6   :  { %v213_v23 = vclamps-f32 %v102_v18, 1.0 }
  0xb7   :  { %v132_v24 = vadd.f32 %v237_v5, %v131_v21 }
  0xb8   :  { %v145_v27 = vadd.f32 1.0, %v213_v23 }
  0xb9   :  { %v136_v28 = vsel %vm135_vm7, %v237_v5, %v132_v24 }
  0xba   :  { %v141_v29 = vsel %vm138_vm8, %v140_v25, %v136_v28  ;;  %v147_v30 = vmul.f32 %v145_v27, %v61_v26 }
  0xbb   :  { %v142_v31 = vmul.f32 %v141_v29, %v117_v9 }
  0xbc   :  { %215 = vmatmul.msk.f32.vlgmr.msra.gmra.mxu1 %vm161_vm9, %v147_v30 }
  0xbd   :  { %v214_v32 = vclamps-f32 %v142_v31, 1.0 }
  0xbf   :  { %v146_v34 = vadd.f32 1.0, %v214_v32 }
  0xc1   :  { %v148_v35 = vmul.f32 %v146_v34, %v62_v33 }
  0xc3   :  { %216 = vmatmul.msk.f32.vlgmr.msra.gmra.mxu2 %vm161_vm9, %v148_v35 }
 0x139   :  { %v185_v36 = vpop.f32.mrf.mxu1 }
 0x13a   :  { %v186_v37 = vadd.f32 %v233_v8, %v185_v36 }
 0x13c   :  { %191 = vst.msk [vmem:[#allocation2] sm:$0xff] %vm31_vm0, %v186_v37 }
 0x146   :  { %v188_v17 = vpop.f32.mrf.mxu2 }
 0x147   :  { %v189_v13 = vadd.f32 %v233_v8, %v188_v17 }
 0x149   :  { %192 = vst.msk [vmem:[#allocation2 + $0x8] sm:$0xff] %vm31_vm0, %v189_v13 }
 0x14a   :  { %205 = dma.vmem_to_hbm [thread:$0]  %s198_s22, 256, %s200_s25, [#allocation3], %s265_s26, %s265_s26, %s266_s27  }
 0x14b   :  { %262 = dma.done.wait [#allocation3], 256  }
 0x14c   :  { %263 = vsyncadd [#allocation3], 4294967040 }
 0x14d   :  { %210 = vsyncpa [#allocation3], 1 }

</bundles_post_ra>
